<compile_context>
chip_gen: v7x
topology: tpu7x:2x2x1
jax: 0.10.0
libtpu: 0.0.40
codegen_flags: <defaults>
</compile_context>

<pallas_src>
import jax
import jax.numpy as jnp
from jax.experimental import pallas as pl
from jax.experimental.pallas import tpu as pltpu

LANE = 128


def _round_up(x, m):
    return ((x + m - 1) // m) * m


def _make_kernel(T, q_tile, halo):
    def kernel(x_ref, w_ref, b_ref, o_ref):
        # x_ref: (C_in_p, L_x)              full (pre-padded) row of this batch
        # w_ref: (T, C_out*stride, C_in_p)  per-tap polyphase weights
        # b_ref: (C_out*stride, 1)          phase-major bias column (f32)
        # o_ref: (C_out*stride, q_tile)     phase-major output tile (lane-dense)
        q0 = pl.multiple_of(pl.program_id(1) * q_tile, LANE)
        # One aligned dynamic load; per-tap shifts are static value slices.
        win = x_ref[:, pl.ds(q0, q_tile + halo)]           # (C_in_p, q_tile+halo)
        acc = jnp.dot(w_ref[0], win[:, 0:q_tile],
                      preferred_element_type=jnp.float32)
        for m in range(1, T):
            acc = acc + jnp.dot(w_ref[m], win[:, m:m + q_tile],
                                preferred_element_type=jnp.float32)
        acc = acc + b_ref[...]                              # f32 bias add
        o_ref[...] = acc.astype(o_ref.dtype)
    return kernel


def upsample_conv_transpose1d(x, weight, bias, *, stride, padding, output_padding):
    """x: (N, C_in, L_in) NCL (PyTorch layout).
    weight: (C_in, C_out, K) (PyTorch ConvTranspose1d layout).
    bias: (C_out,).
    Returns y: (N, C_out, L_out) NCL."""
    N, C_in, L_in = x.shape
    C_in_w, C_out, K = weight.shape
    assert C_in_w == C_in
    L_out = (L_in - 1) * stride - 2 * padding + K + output_padding
    assert L_out > 0

    T = -(-K // stride)                       # taps per polyphase filter
    assert T - 1 <= LANE, "halo assumed to fit in 128 lanes"
    halo = LANE                               # aligned over-read (>= T-1)
    C_in_p = max(_round_up(C_in, 8), 8)       # sublane-aligned channel count
    S = C_out * stride                        # phase-major output rows

    # Phase-major output: y_full[co, q*stride + p] for q in [0, Q). Crop at
    # `padding` afterwards, so we need Q*stride >= padding + L_out.
    Q = -(-(padding + L_out) // stride)
    q_tile = min(_round_up(Q, LANE), 2048)
    if N == 1:
        # keep both v7x TensorCores busy when the batch axis gives no parallelism
        q_tile = min(q_tile, max(LANE, _round_up(-(-Q // 2), LANE)))
    Q_pad = _round_up(Q, q_tile)
    n_qt = Q_pad // q_tile

    # Input row, left-padded by T-1 so x_pad[ci, q+m] == x[ci, q-(T-1-m)],
    # zero-extended on the right far enough for the last tile's window.
    L_x = max(Q_pad + halo, (T - 1) + L_in)
    x_pad = jnp.pad(x, ((0, 0), (0, C_in_p - C_in),
                        (T - 1, L_x - (T - 1) - L_in)))     # keeps x.dtype

    # Per-tap polyphase weights:
    #   WT[m, co*stride + p, ci] = weight[ci, co, (T-1-m)*stride + p]
    # (zero where the tap index >= K or ci >= C_in).
    Kp = T * stride
    w_p = jnp.pad(weight.astype(jnp.float32),
                  ((0, C_in_p - C_in), (0, 0), (0, Kp - K)))
    w_r = w_p.reshape(C_in_p, C_out, T, stride)[:, :, ::-1, :]   # (ci, co, m, p)
    WT = jnp.transpose(w_r, (2, 1, 3, 0)).reshape(T, S, C_in_p).astype(x.dtype)

    # Phase-major bias column: row co*stride + p gets bias[co].
    bias2 = jnp.repeat(bias.astype(jnp.float32), stride).reshape(S, 1)

    kernel = _make_kernel(T, q_tile, halo)

    itemsize = jnp.dtype(x.dtype).itemsize
    cost = pl.CostEstimate(
        flops=2 * N * S * Q * T * C_in,
        transcendentals=0,
        bytes_accessed=(N * C_in_p * L_x * itemsize
                        + T * S * C_in_p * itemsize
                        + S * 4
                        + N * S * Q_pad * itemsize))

    # Raise the scoped VMEM limit only when the resident row + blocks need it
    # (matters on v5e's 16 MiB / v7x's 32 MiB default scoped limits).
    vmem_est = 2 * (C_in_p * L_x * itemsize          # double-buffered input row
                    + S * q_tile * itemsize          # double-buffered out block
                    + T * S * C_in_p * itemsize + S * 4)
    cp_kwargs = dict(dimension_semantics=("parallel", "parallel"))
    if vmem_est > 12 * (1 << 20):
        cp_kwargs["vmem_limit_bytes"] = int(min(vmem_est + (4 << 20), 64 << 20))

    out_pm = pl.pallas_call(
        kernel,
        out_shape=jax.ShapeDtypeStruct((N, S, Q_pad), x.dtype),
        grid_spec=pl.GridSpec(
            grid=(N, n_qt),
            in_specs=[
                pl.BlockSpec((None, C_in_p, L_x), lambda n, q: (n, 0, 0)),
                pl.BlockSpec((T, S, C_in_p), lambda n, q: (0, 0, 0)),
                pl.BlockSpec((S, 1), lambda n, q: (0, 0)),
            ],
            out_specs=pl.BlockSpec((None, S, q_tile), lambda n, q: (n, 0, q)),
        ),
        compiler_params=pltpu.CompilerParams(**cp_kwargs),
        cost_estimate=cost,
    )(x_pad, WT, bias2)

    # Fused XLA epilogue: interleave phases and crop the `padding` offset
    # (bias already applied in-kernel). Single read of out_pm, single write of y.
    y_full = jnp.transpose(out_pm.reshape(N, C_out, stride, Q_pad),
                           (0, 1, 3, 2)).reshape(N, C_out, Q_pad * stride)
    y = y_full[:, :, padding:padding + L_out]
    return y.astype(x.dtype)


def _reference(x, weight, bias, *, stride, padding, output_padding):
    """Direct (slow) transposed-conv reference in plain JAX for verification."""
    N, C_in, L_in = x.shape
    _, C_out, K = weight.shape
    L_out = (L_in - 1) * stride - 2 * padding + K + output_padding
    F = max((L_in - 1) * stride + K, padding + L_out)
    full = jnp.zeros((N, C_out, F), jnp.float32)
    for i in range(L_in):
        contrib = jnp.einsum('nc,cok->nok', x[:, :, i], weight)
        full = full.at[:, :, i * stride:i * stride + K].add(contrib)
    y = full[:, :, padding:padding + L_out]
    return y + bias.reshape(1, C_out, 1)


if __name__ == "__main__":
    # Module config (typical 4x upsampler, output_padding < stride):
    in_channels, out_channels = 4, 8
    kernel_size, stride = 25, 4
    padding, output_padding = 11, 1

    N, L_in = 2, 16

    key = jax.random.PRNGKey(0)
    kx, kw, kb = jax.random.split(key, 3)
    x = jax.random.normal(kx, (N, in_channels, L_in), dtype=jnp.float32)
    # ConvTranspose1d weight shape: (in_channels, out_channels, kernel_size)
    weight = 0.1 * jax.random.normal(
        kw, (in_channels, out_channels, kernel_size), dtype=jnp.float32)
    bias = 0.1 * jax.random.normal(kb, (out_channels,), dtype=jnp.float32)

    fwd = jax.jit(lambda a, w, b: upsample_conv_transpose1d(
        a, w, b, stride=stride, padding=padding, output_padding=output_padding))

    y = fwd(x, weight, bias)
    y = jax.block_until_ready(y)

    y_ref = _reference(
        x, weight, bias,
        stride=stride, padding=padding, output_padding=output_padding)

    L_out = (L_in - 1) * stride - 2 * padding + kernel_size + output_padding
    assert y.shape == (N, out_channels, L_out), y.shape
    assert jnp.allclose(y, y_ref, atol=1e-4, rtol=1e-4), "mismatch vs reference"

    print("KERNEL_OK")
</pallas_src>

<mosaic_0001>
module attributes {stable_mosaic.version = 11 : i64} {
  func.func @kernel(%arg0: i32, %arg1: i32, %arg2: memref<1x8x256xf32, #tpu.memory_space<vmem>>, %arg3: memref<7x32x8xf32, #tpu.memory_space<vmem>>, %arg4: memref<32x1xf32, #tpu.memory_space<vmem>>, %arg5: memref<1x32x128xf32, #tpu.memory_space<vmem>>) attributes {dimension_semantics = [#tpu.dimension_semantics<parallel>, #tpu.dimension_semantics<parallel>], iteration_bounds = array<i64: 2, 1>, scalar_prefetch = 0 : i64, scratch_operands = 0 : i64, tpu.core_type = #tpu.core_type<tc>, window_params = [{transform_indices = @transform_0, window_bounds = array<i64: 1, 8, 256>}, {pipeline_mode = #tpu.pipeline_mode<synchronous>, transform_indices = @transform_1, window_bounds = array<i64: 7, 32, 8>}, {pipeline_mode = #tpu.pipeline_mode<synchronous>, transform_indices = @transform_2, window_bounds = array<i64: 32, 1>}, {transform_indices = @transform_3, window_bounds = array<i64: 1, 32, 128>}]} {
    %c128_i32 = arith.constant 128 : i32
    %0 = arith.muli %arg1, %c128_i32 : i32
    %1 = tpu.assume_multiple %0, 128 : i32
    %c0 = arith.constant 0 : index
    %c0_0 = arith.constant 0 : index
    %2 = arith.index_cast %1 : i32 to index
    %3 = vector.load %arg2[%c0, %c0_0, %2] : memref<1x8x256xf32, #tpu.memory_space<vmem>>, vector<1x8x256xf32>
    %4 = vector.shape_cast %3 : vector<1x8x256xf32> to vector<8x256xf32>
    %c0_1 = arith.constant 0 : index
    %c0_2 = arith.constant 0 : index
    %c0_3 = arith.constant 0 : index
    %5 = vector.load %arg3[%c0_1, %c0_2, %c0_3] : memref<7x32x8xf32, #tpu.memory_space<vmem>>, vector<1x32x8xf32>
    %6 = vector.shape_cast %5 : vector<1x32x8xf32> to vector<32x8xf32>
    %7 = vector.extract_strided_slice %4 {offsets = [0, 0], sizes = [8, 128], strides = [1, 1]} : vector<8x256xf32> to vector<8x128xf32>
    %cst = arith.constant dense<0.000000e+00> : vector<32x128xf32>
    %8 = tpu.matmul %6, %7, %cst {dimension_numbers = #tpu.dot_dimension_numbers<[1], [0], [0], [1], [0, 0, 1, 1], [], []>} : vector<32x8xf32>, vector<8x128xf32>, vector<32x128xf32> -> vector<32x128xf32>
    %c1 = arith.constant 1 : index
    %c0_4 = arith.constant 0 : index
    %c0_5 = arith.constant 0 : index
    %9 = vector.load %arg3[%c1, %c0_4, %c0_5] : memref<7x32x8xf32, #tpu.memory_space<vmem>>, vector<1x32x8xf32>
    %10 = vector.shape_cast %9 : vector<1x32x8xf32> to vector<32x8xf32>
    %11 = vector.extract_strided_slice %4 {offsets = [0, 1], sizes = [8, 128], strides = [1, 1]} : vector<8x256xf32> to vector<8x128xf32>
    %cst_6 = arith.constant dense<0.000000e+00> : vector<32x128xf32>
    %12 = tpu.matmul %10, %11, %cst_6 {dimension_numbers = #tpu.dot_dimension_numbers<[1], [0], [0], [1], [0, 0, 1, 1], [], []>} : vector<32x8xf32>, vector<8x128xf32>, vector<32x128xf32> -> vector<32x128xf32>
    %13 = arith.addf %8, %12 : vector<32x128xf32>
    %c2 = arith.constant 2 : index
    %c0_7 = arith.constant 0 : index
    %c0_8 = arith.constant 0 : index
    %14 = vector.load %arg3[%c2, %c0_7, %c0_8] : memref<7x32x8xf32, #tpu.memory_space<vmem>>, vector<1x32x8xf32>
    %15 = vector.shape_cast %14 : vector<1x32x8xf32> to vector<32x8xf32>
    %16 = vector.extract_strided_slice %4 {offsets = [0, 2], sizes = [8, 128], strides = [1, 1]} : vector<8x256xf32> to vector<8x128xf32>
    %cst_9 = arith.constant dense<0.000000e+00> : vector<32x128xf32>
    %17 = tpu.matmul %15, %16, %cst_9 {dimension_numbers = #tpu.dot_dimension_numbers<[1], [0], [0], [1], [0, 0, 1, 1], [], []>} : vector<32x8xf32>, vector<8x128xf32>, vector<32x128xf32> -> vector<32x128xf32>
    %18 = arith.addf %13, %17 : vector<32x128xf32>
    %c3 = arith.constant 3 : index
    %c0_10 = arith.constant 0 : index
    %c0_11 = arith.constant 0 : index
    %19 = vector.load %arg3[%c3, %c0_10, %c0_11] : memref<7x32x8xf32, #tpu.memory_space<vmem>>, vector<1x32x8xf32>
    %20 = vector.shape_cast %19 : vector<1x32x8xf32> to vector<32x8xf32>
    %21 = vector.extract_strided_slice %4 {offsets = [0, 3], sizes = [8, 128], strides = [1, 1]} : vector<8x256xf32> to vector<8x128xf32>
    %cst_12 = arith.constant dense<0.000000e+00> : vector<32x128xf32>
    %22 = tpu.matmul %20, %21, %cst_12 {dimension_numbers = #tpu.dot_dimension_numbers<[1], [0], [0], [1], [0, 0, 1, 1], [], []>} : vector<32x8xf32>, vector<8x128xf32>, vector<32x128xf32> -> vector<32x128xf32>
    %23 = arith.addf %18, %22 : vector<32x128xf32>
    %c4 = arith.constant 4 : index
    %c0_13 = arith.constant 0 : index
    %c0_14 = arith.constant 0 : index
    %24 = vector.load %arg3[%c4, %c0_13, %c0_14] : memref<7x32x8xf32, #tpu.memory_space<vmem>>, vector<1x32x8xf32>
    %25 = vector.shape_cast %24 : vector<1x32x8xf32> to vector<32x8xf32>
    %26 = vector.extract_strided_slice %4 {offsets = [0, 4], sizes = [8, 128], strides = [1, 1]} : vector<8x256xf32> to vector<8x128xf32>
    %cst_15 = arith.constant dense<0.000000e+00> : vector<32x128xf32>
    %27 = tpu.matmul %25, %26, %cst_15 {dimension_numbers = #tpu.dot_dimension_numbers<[1], [0], [0], [1], [0, 0, 1, 1], [], []>} : vector<32x8xf32>, vector<8x128xf32>, vector<32x128xf32> -> vector<32x128xf32>
    %28 = arith.addf %23, %27 : vector<32x128xf32>
    %c5 = arith.constant 5 : index
    %c0_16 = arith.constant 0 : index
    %c0_17 = arith.constant 0 : index
    %29 = vector.load %arg3[%c5, %c0_16, %c0_17] : memref<7x32x8xf32, #tpu.memory_space<vmem>>, vector<1x32x8xf32>
    %30 = vector.shape_cast %29 : vector<1x32x8xf32> to vector<32x8xf32>
    %31 = vector.extract_strided_slice %4 {offsets = [0, 5], sizes = [8, 128], strides = [1, 1]} : vector<8x256xf32> to vector<8x128xf32>
    %cst_18 = arith.constant dense<0.000000e+00> : vector<32x128xf32>
    %32 = tpu.matmul %30, %31, %cst_18 {dimension_numbers = #tpu.dot_dimension_numbers<[1], [0], [0], [1], [0, 0, 1, 1], [], []>} : vector<32x8xf32>, vector<8x128xf32>, vector<32x128xf32> -> vector<32x128xf32>
    %33 = arith.addf %28, %32 : vector<32x128xf32>
    %c6 = arith.constant 6 : index
    %c0_19 = arith.constant 0 : index
    %c0_20 = arith.constant 0 : index
    %34 = vector.load %arg3[%c6, %c0_19, %c0_20] : memref<7x32x8xf32, #tpu.memory_space<vmem>>, vector<1x32x8xf32>
    %35 = vector.shape_cast %34 : vector<1x32x8xf32> to vector<32x8xf32>
    %36 = vector.extract_strided_slice %4 {offsets = [0, 6], sizes = [8, 128], strides = [1, 1]} : vector<8x256xf32> to vector<8x128xf32>
    %cst_21 = arith.constant dense<0.000000e+00> : vector<32x128xf32>
    %37 = tpu.matmul %35, %36, %cst_21 {dimension_numbers = #tpu.dot_dimension_numbers<[1], [0], [0], [1], [0, 0, 1, 1], [], []>} : vector<32x8xf32>, vector<8x128xf32>, vector<32x128xf32> -> vector<32x128xf32>
    %38 = arith.addf %33, %37 : vector<32x128xf32>
    %c0_22 = arith.constant 0 : index
    %c0_23 = arith.constant 0 : index
    %39 = vector.load %arg4[%c0_22, %c0_23] : memref<32x1xf32, #tpu.memory_space<vmem>>, vector<32x1xf32>
    %40 = vector.broadcast %39 : vector<32x1xf32> to vector<32x128xf32>
    %41 = arith.addf %38, %40 : vector<32x128xf32>
    %c0_24 = arith.constant 0 : index
    %c0_25 = arith.constant 0 : index
    %c0_26 = arith.constant 0 : index
    %42 = vector.load %arg5[%c0_24, %c0_25, %c0_26] : memref<1x32x128xf32, #tpu.memory_space<vmem>>, vector<1x32x128xf32>
    %43 = vector.shape_cast %42 : vector<1x32x128xf32> to vector<32x128xf32>
    %44 = vector.shape_cast %41 : vector<32x128xf32> to vector<1x32x128xf32>
    tpu.vector_store %arg5[%c0_24, %c0_25, %c0_26], %44 {strides = array<i32>} : memref<1x32x128xf32, #tpu.memory_space<vmem>>, vector<1x32x128xf32>,
    return
  }
  func.func @transform_0(%arg0: i32, %arg1: i32) -> (i32, i32, i32) {
    %c0_i32 = arith.constant 0 : i32
    %c0_i32_0 = arith.constant 0 : i32
    %c0_i32_1 = arith.constant 0 : i32
    return %arg0, %c0_i32, %c0_i32_0 : i32, i32, i32
  }
  func.func @transform_1(%arg0: i32, %arg1: i32) -> (i32, i32, i32) {
    %c0_i32 = arith.constant 0 : i32
    %c0_i32_0 = arith.constant 0 : i32
    %c0_i32_1 = arith.constant 0 : i32
    %c0_i32_2 = arith.constant 0 : i32
    return %c0_i32, %c0_i32_0, %c0_i32_1 : i32, i32, i32
  }
  func.func @transform_2(%arg0: i32, %arg1: i32) -> (i32, i32) {
    %c0_i32 = arith.constant 0 : i32
    %c0_i32_0 = arith.constant 0 : i32
    %c0_i32_1 = arith.constant 0 : i32
    return %c0_i32, %c0_i32_0 : i32, i32
  }
  func.func @transform_3(%arg0: i32, %arg1: i32) -> (i32, i32, i32) {
    %c0_i32 = arith.constant 0 : i32
    %c0_i32_0 = arith.constant 0 : i32
    return %arg0, %c0_i32, %arg1 : i32, i32, i32
  }
}

</mosaic_0001>

<bundles_post_ra>
// kernel: _lambda_.1
= control target key start
LH: loop header
LB: loop body
LE: loop exit
PB: predicated region body
PF: predicated region fallthrough
CT: control target
= control target key end

     0   :  { %s1353_s12 = smov 0   ;;  %s1355_s13 = smov 0   ;;  %s1520_s0 = inlined_call_operand.vmem [shape: f32[2,8,256], index: 0, kind: input, shape index: {}]   ;;  %s1521_s1 = inlined_call_operand.vmem [shape: f32[7,32,8], index: 1, kind: input, shape index: {}]   ;;  %s1522_s2 = inlined_call_operand.vmem [shape: f32[32,1], index: 2, kind: input, shape index: {}]   ;;  %s1523_s3 = inlined_call_operand.vmem [shape: f32[2,32,128], index: 3, kind: output, shape index: {}]  }
   0x1   :  { %s1357_s14 = smov 0  }
   0x2 LB: > { %s25_s15 = sadd.s32 1, %s1320_s13  ;;  %p1091_p0 = scmp.ge.s32.totalorder %s1324_s14, 1  ;;  %s1324_s14 = sphi %s1357_s14, %s13_s14   ;;  %s1320_s13 = sphi %s1355_s13, %s1525_s13   ;;  %s1316_s12 = sphi %s1353_s12, %s1524_s12  }
   0x3   : > { %p27_p1 = scmp.ge.s32.totalorder %s25_s15, 2  ;;  %p151_p2 = scmp.lt.s32.totalorder %s1324_s14, 3 }
   0x5   : > { %s1527_s15 = smov (%p27_p1, %s25_s15), 0  ;;  %p152_p3 = pnand %p1091_p0, %p151_p2 }
   0x6   : > { %p178_p4 = scmp.lt.s32.totalorder (!%p152_p3), %s1316_s12, 1  ;;  %v1096_v0 = vld [vmem:[%s1521_s1 + $0x20] sm:$0xff] (!%p152_p3)  ;;  %vm216_vm0 = vcmask (!%p152_p3), 64512   ;;  %s1326_s24 = smov (!%p152_p3), 125   ;;  %v977_v4 = vld [vmem:[%s1522_s2 + $0x8] sm:$0xff] (!%p152_p3)  ;;  %v1332_v6 = vmov (!%p152_p3), 0  }
   0x7   : > { %155 = sbr.rel (%p152_p3) target bundleno = 386 (0x182), region = 32  ;;  %1189 = vmatprep.mubr.msk.f32.mxu1 (!%p152_p3), %vm216_vm0, %v1096_v0  ;;  %v1116_v1 = vld [vmem:[%s1521_s1 + $0x60] sm:$0xff] (!%p152_p3)  ;;  %s1327_s25 = smov (!%p152_p3), 127   ;;  %1301 = vset.pattern.permute.xlu1 (!%p152_p3), %v1332_v6  ;;  %v978_v7 = vld [vmem:[%s1522_s2 + $0x10] sm:$0xff] (!%p152_p3)  ;;  %v979_v8 = vld [vmem:[%s1522_s2 + $0x18] sm:$0xff] (!%p152_p3)  ;;  %vm533_vm1 = vcmask (!%p152_p3), 1022976  }
   0x8   : > { %1213 = vmatprep.mubr.msk.f32.mxu0 (!%p152_p3), %vm216_vm0, %v1116_v1  ;;  %s1328_s26 = smov (!%p152_p3), 124   ;;  %s1329_s27 = smov (!%p152_p3), 126   ;;  %v976_v5 = vld [vmem:[%s1522_s2] sm:$0xff] (!%p152_p3)  ;;  %1300 = vset.pattern.permute.xlu0 (!%p152_p3), %v1332_v6  ;;  %vm213_vm2 = vcmask (!%p152_p3), 1039360   ;;  %v1117_v15 = vld [vmem:[%s1521_s1 + $0x68] sm:$0xff] (!%p152_p3)  ;;  %vm646_vm3 = vcmask (!%p152_p3), 1014784  }
   0x9   : > { %s1330_s28 = smov (!%p152_p3), 123   ;;  %s1331_s29 = smov (!%p152_p3), 122   ;;  %v1097_v16 = vld [vmem:[%s1521_s1 + $0x28] sm:$0xff] (!%p152_p3)  ;;  %v1098_v17 = vld [vmem:[%s1521_s1 + $0x30] sm:$0xff] (!%p152_p3)  ;;  %v1124_v20 = vld [vmem:[%s1521_s1 + $0x80] sm:$0xff] (!%p152_p3)  ;;  %vm420_vm4 = vcmask (!%p152_p3), 1031168  }
   0xa   : > { %v1099_v22 = vld [vmem:[%s1521_s1 + $0x38] sm:$0xff] (!%p152_p3)  ;;  %v198_v23 = vld [vmem:[%s1521_s1] sm:$0xff] (!%p152_p3)  ;;  %v199_v27 = vld [vmem:[%s1521_s1 + $0x8] sm:$0xff] (!%p152_p3)  ;;  %vm759_vm5 = vcmask (!%p152_p3), 1006592   ;;  %vm872_vm6 = vcmask (!%p152_p3), 998400  }
   0xb   : > { %v1125_v28 = vld [vmem:[%s1521_s1 + $0x88] sm:$0xff] (!%p152_p3)  ;;  %v200_v29 = vld [vmem:[%s1521_s1 + $0x10] sm:$0xff] (!%p152_p3)  ;;  %v201_v34 = vld [vmem:[%s1521_s1 + $0x18] sm:$0xff] (!%p152_p3) }
   0xc   : > { %v1126_v32 = vld [vmem:[%s1521_s1 + $0x90] sm:$0xff] (!%p152_p3)  ;;  %v1127_v35 = vld [vmem:[%s1521_s1 + $0x98] sm:$0xff] (!%p152_p3)  ;;  %v1108_v36 = vld [vmem:[%s1521_s1 + $0x40] sm:$0xff] (!%p152_p3) }
   0xd   : > { %v1132_v37 = vld [vmem:[%s1521_s1 + $0xa0] sm:$0xff] (!%p152_p3)  ;;  %v1109_v40 = vld [vmem:[%s1521_s1 + $0x48] sm:$0xff] (!%p152_p3)  ;;  %v1110_v43 = vld [vmem:[%s1521_s1 + $0x50] sm:$0xff] (!%p152_p3) }
   0xe   : > { %s1529_s12 = smov (!%p178_p4, %s1316_s12), 1  ;;  %v1133_v41 = vld [vmem:[%s1521_s1 + $0xa8] sm:$0xff]  ;;  %v1134_v44 = vld [vmem:[%s1521_s1 + $0xb0] sm:$0xff]  ;;  %v1111_v45 = vld [vmem:[%s1521_s1 + $0x58] sm:$0xff] }
   0xf   : > { %s1150_s20 = sshll.u32 %s1529_s12, 4  ;;  %v1135_v46 = vld [vmem:[%s1521_s1 + $0xb8] sm:$0xff]  ;;  %v1140_v47 = vld [vmem:[%s1521_s1 + $0xc0] sm:$0xff]  ;;  %v1118_v48 = vld [vmem:[%s1521_s1 + $0x70] sm:$0xff]  ;;  %s1151_s21 = sshll.u32 %s1529_s12, 5 }
  0x10   : > { %s182_s23 = scalar_lea.vmem %s1520_s0, %s1150_s20  ;;  %v1141_v49 = vld [vmem:[%s1521_s1 + $0xc8] sm:$0xff]  ;;  %v1142_v50 = vld [vmem:[%s1521_s1 + $0xd0] sm:$0xff]  ;;  %v1119_v51 = vld [vmem:[%s1521_s1 + $0x78] sm:$0xff] }
  0x11   : > { %v196_v2 = vld [vmem:[%s182_s23] sm:$0xff]  ;;  %v197_v3 = vld [vmem:[%s182_s23 + $0x8] sm:$0xff]  ;;  %v1143_v52 = vld [vmem:[%s1521_s1 + $0xd8] sm:$0xff] }
  0x12   : > { %529 = vrot.lane.b32.xlu1 %v196_v2, %s1326_s24  ;;  %209 = vrot.lane.b32.xlu0 %v196_v2, %s1327_s25 }
  0x16   : > { %531 = vrot.lane.b32.xlu1 %v197_v3, %s1326_s24  ;;  %211 = vrot.lane.b32.xlu0 %v197_v3, %s1327_s25  ;;  %s190_s24 = scalar_lea.vmem %s1523_s3, %s1151_s21 }
  0x1a   : > { %644 = vrot.lane.b32.xlu1 %v197_v3, %s1328_s26  ;;  %642 = vrot.lane.b32.xlu0 %v196_v2, %s1328_s26 }
  0x1e   : > { %418 = vrot.lane.b32.xlu1 %v197_v3, %s1329_s27  ;;  %416 = vrot.lane.b32.xlu0 %v196_v2, %s1329_s27 }
  0x22   : > { %757 = vrot.lane.b32.xlu1 %v197_v3, %s1330_s28  ;;  %755 = vrot.lane.b32.xlu0 %v196_v2, %s1330_s28 }
  0x26   : > { %870 = vrot.lane.b32.xlu1 %v197_v3, %s1331_s29  ;;  %868 = vrot.lane.b32.xlu0 %v196_v2, %s1331_s29 }
  0x2a   : > { %987 = vperm.xlu1 %1301, %v977_v4   ;;  %982 = vperm.xlu0 %1300, %v976_v5  }
  0x2e   : > { %992 = vperm.xlu1 %1301, %v978_v7   ;;  %997 = vperm.xlu0 %1300, %v979_v8  }
  0x84   : > { %v530_v9 = vpop.permute.xlu1 %529  ;;  %v210_v10 = vpop.permute.xlu0 %209 }
  0x88   : > { %v532_v11 = vpop.permute.xlu1 %531  ;;  %v212_v12 = vpop.permute.xlu0 %211 }
  0x89   : > { %v1397_v13 = vsel %vm533_vm1, %v530_v9, %v532_v11  ;;  %v214_v14 = vsel %vm213_vm2, %v210_v10, %v212_v12 }
  0x8a   : > { %1187 = vmatprep.subr.mxu1 %v214_v14  ;;  %1211 = vmatprep.subr.mxu0 %v1397_v13 }
  0x8b   : > { %1188 = vmatpush3.msra.mxu1 %v214_v14  ;;  %1212 = vmatpush3.msra.mxu0 %v1397_v13 }
  0x8c   : > { %1214 = vmatmul.mubr.msk.f32.vlgmr.msra.gmra.mrb[0].mxu0 %vm216_vm0, %v1117_v15  ;;  %v645_v18 = vpop.permute.xlu1 %644  ;;  %1190 = vmatmul.mubr.msk.f32.vlgmr.msra.gmra.mrb[0].mxu1 %vm216_vm0, %v1097_v16  ;;  %v643_v19 = vpop.permute.xlu0 %642 }
  0x8d   : > { %1195 = vmatprep.subr.mxu1 %v196_v2  ;;  %v647_v21 = vsel %vm646_vm3, %v643_v19, %v645_v18  ;;  %1192 = vmatprep.mubr.msk.f32.mxu1 %vm216_vm0, %v1098_v17 }
  0x8e   : > { %1219 = vmatprep.subr.mxu0 %v647_v21  ;;  %1196 = vmatpush3.msra.mxu1 %v196_v2 }
  0x8f   : > { %1220 = vmatpush3.msra.mxu0 %v647_v21  ;;  %1221 = vmatprep.mubr.msk.f32.mxu0 %vm216_vm0, %v1124_v20 }
  0x90   : > { %v419_v24 = vpop.permute.xlu1 %418  ;;  %1193 = vmatmul.mubr.msk.f32.gmra.mrb[2].mxu1 %vm216_vm0, %v1099_v22  ;;  %v417_v25 = vpop.permute.xlu0 %416 }
  0x91   : > { %v421_v26 = vsel %vm420_vm4, %v417_v25, %v419_v24  ;;  %1197 = vmatprep.mubr.msk.f32.mxu1 %vm216_vm0, %v198_v23 }
  0x92   : > { %1203 = vmatprep.subr.mxu1 %v421_v26 }
  0x94   : > { %v758_v30 = vpop.permute.xlu1 %757  ;;  %1198 = vmatmul.mubr.msk.f32.vlgmr.msra.gmra.mrb[0].mxu1 %vm216_vm0, %v199_v27  ;;  %1222 = vmatmul.mubr.msk.f32.vlgmr.msra.gmra.mrb[0].mxu0 %vm216_vm0, %v1125_v28  ;;  %v756_v31 = vpop.permute.xlu0 %755 }
  0x95   : > { %1204 = vmatpush3.msra.mxu1 %v421_v26  ;;  %v760_v33 = vsel %vm759_vm5, %v756_v31, %v758_v30  ;;  %1200 = vmatprep.mubr.msk.f32.mxu1 %vm216_vm0, %v200_v29 }
  0x96   : > { %1243 = vmatprep.subr.mxu1 %v1397_v13  ;;  %1227 = vmatprep.subr.mxu0 %v760_v33 }
  0x97   : > { %1224 = vmatprep.mubr.msk.f32.mxu0 %vm216_vm0, %v1126_v32  ;;  %1228 = vmatpush3.msra.mxu0 %v760_v33 }
  0x98   : > { %1201 = vmatmul.mubr.msk.f32.gmra.mrb[2].mxu1 %vm216_vm0, %v201_v34  ;;  %1225 = vmatmul.mubr.msk.f32.gmra.mrb[2].mxu0 %vm216_vm0, %v1127_v35  ;;  %v871_v38 = vpop.permute.xlu1 %870  ;;  %v869_v39 = vpop.permute.xlu0 %868 }
  0x99   : > { %1205 = vmatprep.mubr.msk.f32.mxu1 %vm216_vm0, %v1108_v36  ;;  %1229 = vmatprep.mubr.msk.f32.mxu0 %vm216_vm0, %v1132_v37  ;;  %v873_v42 = vsel %vm872_vm6, %v869_v39, %v871_v38 }
  0x9a   : > { %1235 = vmatprep.subr.mxu0 %v873_v42 }
  0x9c   : > { %1206 = vmatmul.mubr.msk.f32.vlgmr.msra.gmra.mrb[0].mxu1 %vm216_vm0, %v1109_v40  ;;  %1230 = vmatmul.mubr.msk.f32.vlgmr.msra.gmra.mrb[0].mxu0 %vm216_vm0, %v1133_v41 }
  0x9d   : > { %1244 = vmatpush3.msra.mxu1 %v1397_v13  ;;  %1236 = vmatpush3.msra.mxu0 %v873_v42 }
  0x9e   : > { %1208 = vmatprep.mubr.msk.f32.mxu1 %vm216_vm0, %v1110_v43  ;;  %1232 = vmatprep.mubr.msk.f32.mxu0 %vm216_vm0, %v1134_v44 }
  0xa0   : > { %1209 = vmatmul.mubr.msk.f32.gmra.mrb[2].mxu1 %vm216_vm0, %v1111_v45  ;;  %1233 = vmatmul.mubr.msk.f32.gmra.mrb[2].mxu0 %vm216_vm0, %v1135_v46 }
  0xa1   : > { %1237 = vmatprep.mubr.msk.f32.mxu0 %vm216_vm0, %v1140_v47  ;;  %1216 = vmatprep.mubr.msk.f32.mxu1 %vm216_vm0, %v1118_v48 }
  0xa4   : > { %1238 = vmatmul.mubr.msk.f32.vlgmr.msra.gmra.mrb[0].mxu0 %vm216_vm0, %v1141_v49 }
  0xa5   : > { %1240 = vmatprep.mubr.msk.f32.mxu0 %vm216_vm0, %v1142_v50 }
  0xa8   : > { %1217 = vmatmul.mubr.msk.f32.vlgmr.msra.gmra.mrb[2].mxu1 %vm216_vm0, %v1119_v51  ;;  %1241 = vmatmul.mubr.msk.f32.gmra.mrb[2].mxu0 %vm216_vm0, %v1143_v52 }
  0xa9   : > { %v983_v56 = vpop.permute.xlu0 %982  ;;  %v988_v59 = vpop.permute.xlu1 %987 }
  0xad   : > { %v998_v5 = vpop.permute.xlu0 %997  ;;  %v993_v6 = vpop.permute.xlu1 %992 }
 0x16f   : > { %v1207_v53 = vpop.f32.mrb[0].mxu1 }
 0x170   : > { %v501_v54 = vpop.f32.mrb[1].mxu1 }
 0x177   : > { %v1239_v55 = vpop.f32.mrb[0].mxu0 }
 0x178   : > { %v1245_v57 = vadd.f32 %v1239_v55, %v1207_v53  ;;  %v953_v58 = vpop.f32.mrb[1].mxu0 }
 0x179   : > { %v1246_v60 = vadd.f32 %v953_v58, %v501_v54 }
 0x17a   : > { %v1001_v61 = vadd.f32 %v1245_v57, %v988_v59 }
 0x17b   : > { %v1000_v62 = vadd.f32 %v1246_v60, %v983_v56  ;;  %v1218_v63 = vpop.f32.mrb[2].mxu1  ;;  %v1242_v0 = vpop.f32.mrb[2].mxu0 }
 0x17c   : > { %1005 = vst [vmem:[%s190_s24 + $0x8] sm:$0xff] %v1001_v61  ;;  %v1247_v1 = vadd.f32 %v1242_v0, %v1218_v63  ;;  %v624_v2 = vpop.f32.mrb[3].mxu1  ;;  %v963_v3 = vpop.f32.mrb[3].mxu0 }
 0x17d   : > { %1004 = vst [vmem:[%s190_s24] sm:$0xff] %v1000_v62  ;;  %v1248_v4 = vadd.f32 %v963_v3, %v624_v2 }
 0x17e   : > { %v1003_v7 = vadd.f32 %v1247_v1, %v998_v5 }
 0x17f   : > { %v1002_v8 = vadd.f32 %v1248_v4, %v993_v6 }
 0x180   : > { %1007 = vst [vmem:[%s190_s24 + $0x18] sm:$0xff] %v1003_v7 }
 0x181   : > { %1006 = vst [vmem:[%s190_s24 + $0x10] sm:$0xff] %v1002_v8 }
 0x182 PF: > { %s13_s14 = sadd.s32 1, %s1324_s14   ;;  %s1524_s12 = smov %s1320_s13 }
 0x183   : > { %p10_p5 = scmp.ge.s32.totalorder %s13_s14, 4   ;;  %s1525_s13 = smov %s1527_s15 }
 0x185   :  { %12 = sbr.rel (!%p10_p5) target bundleno = 2 (0x2), region = 69 }

</bundles_post_ra>
